<compile_context>
chip_gen: v6e
topology: v6e:2x2x1
jax: 0.10.0
libtpu: 0.0.40
codegen_flags: <defaults>
</compile_context>

<pallas_src>
import functools
import math

import jax
import jax.numpy as jnp
from jax import lax
from jax.experimental import pallas as pl
from jax.experimental.pallas import tpu as pltpu

_EPS = 1e-8  # F.cosine_similarity default eps


def _round_up(x, m):
    return ((x + m - 1) // m) * m


def _vmem_capacity_bytes():
    # v5e/v6e: 128 MiB, v7x: 64 MiB per TensorCore.  Fall back to the smallest
    # current value if the query is unavailable.
    try:
        cap = getattr(pltpu.get_tpu_info(), "vmem_capacity_bytes", None)
        if cap:
            return int(cap)
    except Exception:
        pass
    return 64 * 1024 * 1024


def _ortho_kernel(*refs, pair_idx, l1, m_rows, n_used):
    """One row tile: unrolled loop over the static pair list.

    refs = (feat_ref_0, ..., feat_ref_{n_used-1}, out_ref); each feat_ref is a
    (tm, D) VMEM tile of one used feature, out_ref is a (1, 128) f32 block.
    """
    feat_refs = refs[:n_used]
    out_ref = refs[n_used]

    tm = feat_refs[0].shape[0]
    row0 = pl.program_id(0) * tm
    rows = lax.broadcasted_iota(jnp.int32, (tm, 1), 0) + row0
    valid = rows < m_rows  # only matters for the (possibly partial) last tile

    # Each used feature tile is loaded once and its norm computed once, then
    # shared by every pair that references the feature.
    feats = [r[...].astype(jnp.float32) for r in feat_refs]
    norms = [jnp.sqrt(jnp.sum(f * f, axis=-1, keepdims=True)) for f in feats]

    total = jnp.zeros((), jnp.float32)
    for i1, i2 in pair_idx:  # static -> unrolled at trace time
        dot = jnp.sum(feats[i1] * feats[i2], axis=-1, keepdims=True)
        # Overflow-safe: multiply norms, not squared norms.
        denom = jnp.maximum(norms[i1] * norms[i2], _EPS)
        cos = dot / denom
        val = jnp.abs(cos) if l1 else cos * cos
        # Rows past m_rows hold undefined data; jnp.where *selects* 0 there so
        # NaN/Inf garbage cannot propagate into the sum.
        val = jnp.where(valid, val, 0.0)
        total = total + jnp.sum(val)

    out_ref[...] = jnp.full(out_ref.shape, total, dtype=out_ref.dtype)


def ortho_feat_loss(features, pairs, l1=False, *, cast_dtype=None):
    """Pallas equivalent of OrthoFeatLoss(pairs)(features, l1)."""
    if not pairs:
        raise ValueError("pairs must be non-empty")
    pairs = [(int(a), int(b)) for (a, b) in pairs]
    used = sorted({i for pr in pairs for i in pr})
    shape0 = tuple(features[used[0]].shape)
    for i in used:
        if tuple(features[i].shape) != shape0:
            raise ValueError(
                "all features referenced by `pairs` must share one shape "
                f"(flat mean == nested mean); got {features[i].shape} vs {shape0}")
    if len(shape0) < 2:
        raise ValueError("features must have at least 2 dims (batch, ..., D)")

    D = int(shape0[-1])
    m_rows = int(math.prod(shape0[:-1]))     # batch * all non-feature dims
    n_pairs = len(pairs)
    n_used = len(used)
    remap = {orig: k for k, orig in enumerate(used)}
    pair_idx = tuple((remap[a], remap[b]) for (a, b) in pairs)

    # Flatten each used feature to (m_rows, D).  No stack, no pad: each used
    # feature is read straight from HBM exactly once by the kernel.
    flat = [jnp.reshape(features[i], (m_rows, D)) for i in used]
    if cast_dtype is not None:
        flat = [f.astype(cast_dtype) for f in flat]
    in_dtype = jnp.result_type(*[f.dtype for f in flat])
    flat = [f if f.dtype == in_dtype else f.astype(in_dtype) for f in flat]
    itemsize = jnp.dtype(in_dtype).itemsize

    # --- tile sizing (lane/sublane-padding aware) ----------------------------
    D_pad = _round_up(D, 128)                 # lanes a (., D) tile occupies
    sub = max(8, 32 // itemsize)              # sublane multiple per dtype
    vmem_cap = _vmem_capacity_bytes()
    budget = min(int(vmem_cap * 0.55), 80 * 1024 * 1024)
    # Per tile row: n_used inputs x (2 pipeline buffers x input itemsize + one
    # live f32 working copy), all at the lane-padded width.
    per_row_bytes = n_used * D_pad * (2 * itemsize + 4)
    tm_max = max(sub, (budget // per_row_bytes) // sub * sub)
    # Keep >= 2 tiles whenever the row count allows it so the "parallel" grid
    # axis can shard across v7x's two TensorCores.
    tm_for_two = max(sub, _round_up(-(-m_rows // 2), sub))
    tm = int(min(tm_max, tm_for_two))
    n_tiles = -(-m_rows // tm)

    need = n_used * tm * D_pad * (2 * itemsize + 4) + 4 * 128 * 4
    vmem_limit = int(min(vmem_cap - (4 << 20), max(need + (8 << 20), 32 << 20)))

    flops = m_rows * (2 * D * (n_used + n_pairs) + 8 * n_pairs)
    cost = pl.CostEstimate(
        flops=int(flops),
        transcendentals=int(n_used * m_rows),          # one sqrt per used row
        bytes_accessed=int(n_used * m_rows * D * itemsize + n_tiles * 128 * 4))

    kernel = functools.partial(_ortho_kernel, pair_idx=pair_idx, l1=bool(l1),
                               m_rows=m_rows, n_used=n_used)
    partials = pl.pallas_call(
        kernel,
        out_shape=jax.ShapeDtypeStruct((n_tiles, 1, 128), jnp.float32),
        grid_spec=pltpu.PrefetchScalarGridSpec(
            num_scalar_prefetch=0,
            grid=(n_tiles,),
            in_specs=[pl.BlockSpec((tm, D), lambda t: (t, 0))
                      for _ in range(n_used)],
            out_specs=pl.BlockSpec((None, 1, 128), lambda t: (t, 0, 0)),
        ),
        compiler_params=pltpu.CompilerParams(
            dimension_semantics=("parallel",),
            vmem_limit_bytes=vmem_limit),
        cost_estimate=cost,
    )(*flat)

    total = jnp.sum(partials[:, 0, 0])
    # Flat mean over all rows == PyTorch's nested mean because all per-(pair,
    # batch) groups have the same (checked) size.
    return total / (n_pairs * m_rows)


def _ref_loss(features, pairs, l1=False):
    """Pure-JAX reference mirroring the PyTorch loop structure."""
    losses = []
    for i1, i2 in pairs:
        for f1, f2 in zip(features[i1], features[i2]):
            f1 = f1.reshape(-1, f1.shape[-1]).astype(jnp.float32)
            f2 = f2.reshape(-1, f2.shape[-1]).astype(jnp.float32)
            dot = jnp.sum(f1 * f2, axis=-1)
            n1 = jnp.sqrt(jnp.sum(f1 * f1, axis=-1))
            n2 = jnp.sqrt(jnp.sum(f2 * f2, axis=-1))
            cos = dot / jnp.maximum(n1 * n2, _EPS)
            val = jnp.abs(cos) if l1 else jnp.square(cos)
            losses.append(jnp.mean(val))
    return jnp.mean(jnp.stack(losses, axis=0))


if __name__ == "__main__":
    key = jax.random.PRNGKey(0)
    B, S, D = 2, 8, 32
    n_feats = 4
    keys = jax.random.split(key, n_feats)
    # features: list of n_feats tensors, each [B, S, D] (cosine over dim=-1)
    features = [jax.random.normal(k, (B, S, D), dtype=jnp.float32) for k in keys]
    pairs = [(0, 1), (2, 3)]

    out = jax.block_until_ready(ortho_feat_loss(features, pairs, l1=False))
    ref = _ref_loss(features, pairs, l1=False)
    assert jnp.allclose(out, ref, atol=1e-5, rtol=1e-4), (out, ref)

    # l1=True branch
    out_l1 = jax.block_until_ready(ortho_feat_loss(features, pairs, l1=True))
    ref_l1 = _ref_loss(features, pairs, l1=True)
    assert jnp.allclose(out_l1, ref_l1, atol=1e-5, rtol=1e-4), (out_l1, ref_l1)

    # Non-multiple-of-8 row count (exercises the partial-tile row mask) plus a
    # feature index shared by two pairs (read from HBM once, reused in-kernel).
    feats2 = [jax.random.normal(k, (2, 10, 32), dtype=jnp.float32)
              for k in jax.random.split(jax.random.PRNGKey(1), 3)]
    pairs2 = [(0, 1), (1, 2)]
    out2 = jax.block_until_ready(ortho_feat_loss(feats2, pairs2, l1=False))
    ref2 = _ref_loss(feats2, pairs2, l1=False)
    assert jnp.allclose(out2, ref2, atol=1e-5, rtol=1e-4), (out2, ref2)

    # bf16 inputs (halved HBM bytes; kernel upcasts to f32 for the reductions).
    out_bf16 = jax.block_until_ready(
        ortho_feat_loss(features, pairs, l1=False, cast_dtype=jnp.bfloat16))
    assert jnp.allclose(out_bf16, ref, atol=2e-2, rtol=2e-2), (out_bf16, ref)

    print("KERNEL_OK")
</pallas_src>

<mosaic_0001>
module attributes {stable_mosaic.version = 11 : i64} {
  func.func @_ortho_kernel(%arg0: i32, %arg1: memref<8x32xf32, #tpu.memory_space<vmem>>, %arg2: memref<8x32xf32, #tpu.memory_space<vmem>>, %arg3: memref<8x32xf32, #tpu.memory_space<vmem>>, %arg4: memref<8x32xf32, #tpu.memory_space<vmem>>, %arg5: memref<1x1x128xf32, #tpu.memory_space<vmem>>) attributes {dimension_semantics = [#tpu.dimension_semantics<parallel>], iteration_bounds = array<i64: 2>, scalar_prefetch = 0 : i64, scratch_operands = 0 : i64, tpu.core_type = #tpu.core_type<tc>, window_params = [{transform_indices = @transform_0, window_bounds = array<i64: 8, 32>}, {transform_indices = @transform_1, window_bounds = array<i64: 8, 32>}, {transform_indices = @transform_2, window_bounds = array<i64: 8, 32>}, {transform_indices = @transform_3, window_bounds = array<i64: 8, 32>}, {transform_indices = @transform_4, window_bounds = array<i64: 1, 1, 128>}]} {
    %c8_i32 = arith.constant 8 : i32
    %0 = arith.muli %arg0, %c8_i32 : i32
    %1 = tpu.iota {dimensions = array<i32: 0>} : vector<8x1xi32>
    %2 = vector.broadcast %0 : i32 to vector<8x1xi32>
    %3 = arith.addi %1, %2 : vector<8x1xi32>
    %c16_i32 = arith.constant 16 : i32
    %4 = vector.broadcast %c16_i32 : i32 to vector<8x1xi32>
    %5 = arith.cmpi slt, %3, %4 : vector<8x1xi32>
    %c0 = arith.constant 0 : index
    %c0_0 = arith.constant 0 : index
    %6 = vector.load %arg1[%c0, %c0_0] : memref<8x32xf32, #tpu.memory_space<vmem>>, vector<8x32xf32>
    %c0_1 = arith.constant 0 : index
    %c0_2 = arith.constant 0 : index
    %7 = vector.load %arg2[%c0_1, %c0_2] : memref<8x32xf32, #tpu.memory_space<vmem>>, vector<8x32xf32>
    %c0_3 = arith.constant 0 : index
    %c0_4 = arith.constant 0 : index
    %8 = vector.load %arg3[%c0_3, %c0_4] : memref<8x32xf32, #tpu.memory_space<vmem>>, vector<8x32xf32>
    %c0_5 = arith.constant 0 : index
    %c0_6 = arith.constant 0 : index
    %9 = vector.load %arg4[%c0_5, %c0_6] : memref<8x32xf32, #tpu.memory_space<vmem>>, vector<8x32xf32>
    %10 = arith.mulf %6, %6 : vector<8x32xf32>
    %cst = arith.constant dense<0.000000e+00> : vector<8xf32>
    %11 = vector.multi_reduction <add>, %10, %cst [1] : vector<8x32xf32> to vector<8xf32>
    %12 = vector.shape_cast %11 : vector<8xf32> to vector<8x1xf32>
    %13 = math.sqrt %12 : vector<8x1xf32>
    %14 = arith.mulf %7, %7 : vector<8x32xf32>
    %cst_7 = arith.constant dense<0.000000e+00> : vector<8xf32>
    %15 = vector.multi_reduction <add>, %14, %cst_7 [1] : vector<8x32xf32> to vector<8xf32>
    %16 = vector.shape_cast %15 : vector<8xf32> to vector<8x1xf32>
    %17 = math.sqrt %16 : vector<8x1xf32>
    %18 = arith.mulf %8, %8 : vector<8x32xf32>
    %cst_8 = arith.constant dense<0.000000e+00> : vector<8xf32>
    %19 = vector.multi_reduction <add>, %18, %cst_8 [1] : vector<8x32xf32> to vector<8xf32>
    %20 = vector.shape_cast %19 : vector<8xf32> to vector<8x1xf32>
    %21 = math.sqrt %20 : vector<8x1xf32>
    %22 = arith.mulf %9, %9 : vector<8x32xf32>
    %cst_9 = arith.constant dense<0.000000e+00> : vector<8xf32>
    %23 = vector.multi_reduction <add>, %22, %cst_9 [1] : vector<8x32xf32> to vector<8xf32>
    %24 = vector.shape_cast %23 : vector<8xf32> to vector<8x1xf32>
    %25 = math.sqrt %24 : vector<8x1xf32>
    %26 = arith.mulf %6, %7 : vector<8x32xf32>
    %cst_10 = arith.constant dense<0.000000e+00> : vector<8xf32>
    %27 = vector.multi_reduction <add>, %26, %cst_10 [1] : vector<8x32xf32> to vector<8xf32>
    %28 = vector.shape_cast %27 : vector<8xf32> to vector<8x1xf32>
    %29 = arith.mulf %13, %17 : vector<8x1xf32>
    %cst_11 = arith.constant 9.99999993E-9 : f32
    %30 = vector.broadcast %cst_11 : f32 to vector<8x1xf32>
    %31 = arith.maximumf %29, %30 : vector<8x1xf32>
    %32 = arith.divf %28, %31 : vector<8x1xf32>
    %33 = arith.mulf %32, %32 : vector<8x1xf32>
    %cst_12 = arith.constant 0.000000e+00 : f32
    %34 = vector.broadcast %cst_12 : f32 to vector<8x1xf32>
    %35 = arith.select %5, %33, %34 : vector<8x1xi1>, vector<8x1xf32>
    %36 = vector.shape_cast %35 : vector<8x1xf32> to vector<1x8x1xf32>
    %cst_13 = arith.constant dense<0.000000e+00> : vector<1xf32>
    %37 = vector.multi_reduction <add>, %36, %cst_13 [1, 2] : vector<1x8x1xf32> to vector<1xf32>
    %38 = vector.shape_cast %37 : vector<1xf32> to vector<1x1x1xf32>
    %39 = vector.extract %38[0, 0, 0] : f32 from vector<1x1x1xf32>
    %cst_14 = arith.constant 0.000000e+00 : f32
    %40 = arith.addf %cst_14, %39 : f32
    %41 = arith.mulf %8, %9 : vector<8x32xf32>
    %cst_15 = arith.constant dense<0.000000e+00> : vector<8xf32>
    %42 = vector.multi_reduction <add>, %41, %cst_15 [1] : vector<8x32xf32> to vector<8xf32>
    %43 = vector.shape_cast %42 : vector<8xf32> to vector<8x1xf32>
    %44 = arith.mulf %21, %25 : vector<8x1xf32>
    %cst_16 = arith.constant 9.99999993E-9 : f32
    %45 = vector.broadcast %cst_16 : f32 to vector<8x1xf32>
    %46 = arith.maximumf %44, %45 : vector<8x1xf32>
    %47 = arith.divf %43, %46 : vector<8x1xf32>
    %48 = arith.mulf %47, %47 : vector<8x1xf32>
    %cst_17 = arith.constant 0.000000e+00 : f32
    %49 = vector.broadcast %cst_17 : f32 to vector<8x1xf32>
    %50 = arith.select %5, %48, %49 : vector<8x1xi1>, vector<8x1xf32>
    %51 = vector.shape_cast %50 : vector<8x1xf32> to vector<1x8x1xf32>
    %cst_18 = arith.constant dense<0.000000e+00> : vector<1xf32>
    %52 = vector.multi_reduction <add>, %51, %cst_18 [1, 2] : vector<1x8x1xf32> to vector<1xf32>
    %53 = vector.shape_cast %52 : vector<1xf32> to vector<1x1x1xf32>
    %54 = vector.extract %53[0, 0, 0] : f32 from vector<1x1x1xf32>
    %55 = arith.addf %40, %54 : f32
    %56 = vector.broadcast %55 : f32 to vector<1x128xf32>
    %c0_19 = arith.constant 0 : index
    %c0_20 = arith.constant 0 : index
    %c0_21 = arith.constant 0 : index
    %57 = vector.load %arg5[%c0_19, %c0_20, %c0_21] : memref<1x1x128xf32, #tpu.memory_space<vmem>>, vector<1x1x128xf32>
    %58 = vector.shape_cast %57 : vector<1x1x128xf32> to vector<1x128xf32>
    %59 = vector.shape_cast %56 : vector<1x128xf32> to vector<1x1x128xf32>
    tpu.vector_store %arg5[%c0_19, %c0_20, %c0_21], %59 {strides = array<i32>} : memref<1x1x128xf32, #tpu.memory_space<vmem>>, vector<1x1x128xf32>,
    return
  }
  func.func @transform_0(%arg0: i32) -> (i32, i32) {
    %c0_i32 = arith.constant 0 : i32
    %c0_i32_0 = arith.constant 0 : i32
    return %arg0, %c0_i32 : i32, i32
  }
  func.func @transform_1(%arg0: i32) -> (i32, i32) {
    %c0_i32 = arith.constant 0 : i32
    %c0_i32_0 = arith.constant 0 : i32
    return %arg0, %c0_i32 : i32, i32
  }
  func.func @transform_2(%arg0: i32) -> (i32, i32) {
    %c0_i32 = arith.constant 0 : i32
    %c0_i32_0 = arith.constant 0 : i32
    return %arg0, %c0_i32 : i32, i32
  }
  func.func @transform_3(%arg0: i32) -> (i32, i32) {
    %c0_i32 = arith.constant 0 : i32
    %c0_i32_0 = arith.constant 0 : i32
    return %arg0, %c0_i32 : i32, i32
  }
  func.func @transform_4(%arg0: i32) -> (i32, i32, i32) {
    %c0_i32 = arith.constant 0 : i32
    %c0_i32_0 = arith.constant 0 : i32
    %c0_i32_1 = arith.constant 0 : i32
    return %arg0, %c0_i32, %c0_i32_0 : i32, i32, i32
  }
}

</mosaic_0001>

<bundles_post_ra>
// kernel: tpu_custom_call.1
= control target key start
LH: loop header
LB: loop body
LE: loop exit
PB: predicated region body
PF: predicated region fallthrough
CT: control target
= control target key end

     0   :  { %s1123_s0 = inlined_call_operand.hbm [shape: f32[16,32], index: 0, kind: input, shape index: {}]   ;;  %s1124_s1 = inlined_call_operand.hbm [shape: f32[16,32], index: 1, kind: input, shape index: {}]   ;;  %s1125_s2 = inlined_call_operand.hbm [shape: f32[16,32], index: 2, kind: input, shape index: {}]   ;;  %s1126_s3 = inlined_call_operand.hbm [shape: f32[16,32], index: 3, kind: input, shape index: {}]   ;;  %s1127_s4 = inlined_call_operand.hbm [shape: f32[2,1,128], index: 4, kind: output, shape index: {}]  }
   0x1   :  { %1133 = sst [smem:[#allocation18_spill]] %s1123_s0 }
   0x2   :  { %1134 = sst [smem:[#allocation19_spill]] %s1124_s1 }
   0x3   :  { %9 = vsyncpa [#allocation3], 0 }
   0x4   :  { %11 = vsyncpa [#allocation3 + $0x1], 0 }
   0x5   :  { %12 = vsyncpa [#allocation6], 0 }
   0x6   :  { %14 = vsyncpa [#allocation6 + $0x1], 0 }
   0x7   :  { %15 = vsyncpa [#allocation9], 0 }
   0x8   :  { %17 = vsyncpa [#allocation9 + $0x1], 0 }
   0x9   :  { %18 = vsyncpa [#allocation4], 0 }
   0xa   :  { %20 = vsyncpa [#allocation4 + $0x1], 0  ;;  %s878_s15 = smov 0   ;;  %s880_s16 = smov 0  }
   0xb   :  { %s882_s17 = smov 0   ;;  %s884_s18 = smov 0  }
   0xc LB: > { %1135 = sst [smem:[#allocation15_spill]] %s842_s17  ;;  %s899_s19 = sadd.s32 4294967295, %s846_s18   ;;  %s846_s18 = sphi %s884_s18, %s1152_s18   ;;  %s842_s17 = sphi %s882_s17, %s1154_s17   ;;  %s838_s16 = sphi %s880_s16, %s1156_s16   ;;  %s834_s15 = sphi %s878_s15, %s1155_s15  }
   0xd   : > { %s565_s20 = sadd.s32 4294967294, %s846_s18   ;;  %s903_s21 = sadd.s32 1, %s846_s18  }
   0xe   : > { %1136 = sst [smem:[#allocation16_spill]] %s903_s21  ;;  %s33_s22 = sadd.s32 1, %s842_s17 }
   0xf   : > { %s30_s23 = ssub.s32 %s846_s18, %s903_s21  ;;  %p40_p0 = scmp.ne.s32.totalorder %s842_s17, %s838_s16 }
  0x10   : > { %p31_p1 = scmp.eq.s32.totalorder %s30_s23, 0  ;;  %p41_p2 = scmp.eq.s32.totalorder %s846_s18, 0 }
  0x11   : > { %p46_p3 = scmp.ne.s32.totalorder %s838_s16, %s834_s15  ;;  %p47_p4 = scmp.eq.s32.totalorder %s899_s19, 0 }
  0x12   : > { %s915_s24 = scalar_select %p31_p1, %s842_s17, %s33_s22  }
  0x13   : > { %p42_p5 = por %p41_p2, %p40_p0  ;;  %p917_p6 = por %p47_p4, %p46_p3 }
  0x14   : > { %1137 = sst [smem:[#allocation17_spill]] %s915_s24  ;;  %p148_p7 = scmp.eq.s32.totalorder %s899_s19, 1 }
  0x15   : > { %s1138_s25 = scalar_select %p917_p6, 1, 0 }
  0x16   : > { %p154_p8 = scmp.eq.s32.totalorder %s565_s20, 1  ;;  %p616_p10 = scmp.lt.s32.totalorder %s846_s18, 2 }
  0x17   : > { %p924_p11 = por %p148_p7, %p40_p0  ;;  %s933_s28 = sand.u32 1, %s842_s17  }
  0x18   : > { %p928_p12 = por %p154_p8, %p46_p3  ;;  %s936_s29 = sshll.u32 %s846_s18, 7 }
  0x19   : > { %s1139_s26 = scalar_select %p924_p11, 1, 0 }
  0x1a   : > { %s1140_s27 = scalar_select %p928_p12, 1, 0 }
  0x1b   : > { %s939_s30 = sshll.u32 %s933_s28, 3  ;;  %p941_p13 = pnand %p616_p10, %p42_p5 }
  0x1c   : > { %s192_s6 = sand.u32 1, %s846_s18   ;;  %s1142_s1 = sld [smem:[#allocation19_spill]] }
  0x1d   : > { %s196_s10 = scalar_lea.vmem [#allocation5], %s939_s30  ;;  %s954_s12 = scalar_lea.sflag [#allocation6], %s192_s6 }
  0x1e   : > { %s203_s11 = sshll.u32 %s196_s10, 4  ;;  %p960_p2 = pneg %p941_p13  ;;  %s204_s11 = int_to_ptr.vmem [resolvable:$true] %s203_s11 }
  0x22   : > { %s950_s9 = scalar_lea.hbm %s1142_s1, %s936_s29  ;;  %s667_s23 = scalar_lea.hbm %s1142_s1, 256 }
  0x23   : > { %s662_s13 = scalar_lea.hbm %s950_s9, 128  ;;  %p668_p5 = scmp.lt.s32.totalorder %s950_s9, %s1142_s1 }
  0x24   : > { %p663_p1 = scmp.ne.s32.totalorder %s950_s9, %s662_s13  ;;  %p669_p7 = scmp.lt.s32.totalorder %s667_s23, %s662_s13 }
  0x26   : > { %p665_p3 = pnand %p960_p2, %p663_p1  ;;  %p670_p8 = por %p669_p7, %p668_p5 }
  0x28   : > { %p666_p4 = pneg %p665_p3 }
  0x2a   : > { %p671_p10 = pnand %p670_p8, %p666_p4 }
  0x2c   : > { %674 = shalt.err (!%p671_p10)
}
  0x2d   : > { %s675_s6 = scalar_lea.vmem %s204_s11, 128  ;;  %s848_s10 = smov [#allocation5]  }
  0x2e   : > { %p676_p9 = scmp.ne.s32.totalorder %s204_s11, %s675_s6  ;;  %s680_s24 = sshll.u32 %s848_s10, 4  ;;  %s681_s24 = int_to_ptr.vmem [resolvable:$false] %s680_s24 }
  0x2f   : > { %s682_s17 = scalar_lea.vmem %s681_s24, 256  ;;  %p683_p1 = scmp.lt.s32.totalorder %s204_s11, %s681_s24 }
  0x30   : > { %p678_p0 = pnand %p676_p9, %p960_p2  ;;  %p684_p3 = scmp.lt.s32.totalorder %s682_s17, %s675_s6 }
  0x32   : > { %p679_p12 = pneg %p678_p0  ;;  %p685_p11 = por %p684_p3, %p683_p1 }
  0x34   : > { %p686_p6 = pnand %p685_p11, %p679_p12 }
  0x36   : > { %689 = shalt.err (!%p686_p6)
}
  0x37   : > { %605 = dma.hbm_to_vmem [thread:$0]  (!%p941_p13), %s950_s9, 128, %s204_s11, %s954_s12  }
  0x38   : > { %p244_p9 = scmp.lt.s32.totalorder %s846_s18, 3  ;;  %s1144_s0 = sld [smem:[#allocation18_spill]] }
  0x39   : > { %p1145_p0 = scmp.ge.s32.totalorder %s846_s18, 1  ;;  %s178_s22 = scalar_lea.vmem [#allocation2], %s939_s30 }
  0x3a   : > { %s185_s23 = sshll.u32 %s178_s22, 4  ;;  %s175_s7 = scalar_lea.sflag [#allocation3], %s933_s28  ;;  %s186_s23 = int_to_ptr.vmem [resolvable:$true] %s185_s23 }
  0x3b   : > { %p988_p6 = pnand %p1145_p0, %p244_p9 }
  0x3d   : > { %s1146_s17 = scalar_select %p988_p6, 1, 0 }
  0x3e   : > { %s984_s24 = scalar_lea.hbm %s1144_s0, %s936_s29  ;;  %s695_s6 = scalar_lea.hbm %s1144_s0, 256 }
  0x3f   : > { %s690_s8 = scalar_lea.hbm %s984_s24, 128  ;;  %p696_p5 = scmp.lt.s32.totalorder %s984_s24, %s1144_s0 }
  0x40   : > { %p691_p11 = scmp.ne.s32.totalorder %s984_s24, %s690_s8  ;;  %p697_p7 = scmp.lt.s32.totalorder %s695_s6, %s690_s8 }
  0x42   : > { %p693_p12 = pnand %p691_p11, %p960_p2  ;;  %p698_p8 = por %p697_p7, %p696_p5 }
  0x44   : > { %p694_p4 = pneg %p693_p12 }
  0x46   : > { %p699_p10 = pnand %p698_p8, %p694_p4 }
  0x48   : > { %702 = shalt.err (!%p699_p10)
}
  0x49   : > { %s703_s20 = scalar_lea.vmem %s186_s23, 128  ;;  %s849_s22 = smov [#allocation2]  }
  0x4a   : > { %p704_p1 = scmp.ne.s32.totalorder %s186_s23, %s703_s20  ;;  %s708_s1 = sshll.u32 %s849_s22, 4  ;;  %s709_s1 = int_to_ptr.vmem [resolvable:$false] %s708_s1 }
  0x4b   : > { %s710_s21 = scalar_lea.vmem %s709_s1, 256  ;;  %p711_p0 = scmp.lt.s32.totalorder %s186_s23, %s709_s1 }
  0x4c   : > { %p706_p3 = pnand %p704_p1, %p960_p2  ;;  %p712_p11 = scmp.lt.s32.totalorder %s710_s21, %s703_s20 }
  0x4e   : > { %p707_p9 = pneg %p706_p3  ;;  %p713_p12 = por %p712_p11, %p711_p0 }
  0x50   : > { %p714_p6 = pnand %p713_p12, %p707_p9 }
  0x52   : > { %717 = shalt.err (!%p714_p6)
}
  0x53   : > { %602 = dma.hbm_to_vmem [thread:$0]  (!%p941_p13), %s984_s24, 128, %s186_s23, %s175_s7  }
  0x54   : > { %s219_s11 = scalar_lea.hbm %s1125_s2, %s936_s29  ;;  %s214_s6 = scalar_lea.vmem [#allocation7], %s939_s30 }
  0x55   : > { %s221_s10 = sshll.u32 %s214_s6, 4  ;;  %s718_s13 = scalar_lea.hbm %s219_s11, 128  ;;  %s222_s10 = int_to_ptr.vmem [resolvable:$true] %s221_s10 }
  0x56   : > { %p719_p4 = scmp.ne.s32.totalorder %s219_s11, %s718_s13  ;;  %s723_s20 = scalar_lea.hbm %s1125_s2, 256 }
  0x57   : > { %p724_p6 = scmp.lt.s32.totalorder %s219_s11, %s1125_s2  ;;  %p725_p8 = scmp.lt.s32.totalorder %s723_s20, %s718_s13 }
  0x58   : > { %p721_p5 = pnand %p719_p4, %p960_p2 }
  0x59   : > { %p726_p10 = por %p725_p8, %p724_p6 }
  0x5a   : > { %p722_p7 = pneg %p721_p5 }
  0x5c   : > { %p727_p1 = pnand %p726_p10, %p722_p7 }
  0x5e   : > { %730 = shalt.err (!%p727_p1)
}
  0x5f   : > { %s731_s24 = scalar_lea.vmem %s222_s10, 128  ;;  %s850_s23 = smov [#allocation7]  }
  0x60   : > { %p732_p3 = scmp.ne.s32.totalorder %s222_s10, %s731_s24  ;;  %s736_s7 = sshll.u32 %s850_s23, 4  ;;  %s737_s7 = int_to_ptr.vmem [resolvable:$false] %s736_s7 }
  0x61   : > { %s738_s8 = scalar_lea.vmem %s737_s7, 256  ;;  %p739_p11 = scmp.lt.s32.totalorder %s222_s10, %s737_s7 }
  0x62   : > { %p734_p9 = pnand %p732_p3, %p960_p2  ;;  %p740_p12 = scmp.lt.s32.totalorder %s738_s8, %s731_s24 }
  0x64   : > { %p735_p0 = pneg %p734_p9  ;;  %p741_p4 = por %p740_p12, %p739_p11 }
  0x66   : > { %p742_p5 = pnand %p741_p4, %p735_p0 }
  0x68   : > { %745 = shalt.err (!%p742_p5)
}
  0x69   : > { %608 = dma.hbm_to_vmem [thread:$0]  (!%p941_p13), %s219_s11, 128, %s222_s10, %s954_s12  }
  0x6a   : > { %s1032_s6 = scalar_lea.hbm %s1126_s3, %s936_s29  ;;  %s232_s13 = scalar_lea.vmem [#allocation8], %s939_s30 }
  0x6b   : > { %s239_s1 = sshll.u32 %s232_s13, 4  ;;  %s229_s21 = scalar_lea.sflag [#allocation9], %s933_s28  ;;  %s240_s1 = int_to_ptr.vmem [resolvable:$true] %s239_s1 }
  0x6c   : > { %s746_s20 = scalar_lea.hbm %s1032_s6, 128  ;;  %s751_s12 = scalar_lea.hbm %s1126_s3, 256 }
  0x6d   : > { %p747_p7 = scmp.ne.s32.totalorder %s1032_s6, %s746_s20  ;;  %p752_p10 = scmp.lt.s32.totalorder %s1032_s6, %s1126_s3 }
  0x6e   : > { %p753_p1 = scmp.lt.s32.totalorder %s751_s12, %s746_s20 }
  0x6f   : > { %p749_p6 = pnand %p747_p7, %p960_p2 }
  0x70   : > { %p754_p3 = por %p753_p1, %p752_p10 }
  0x71   : > { %p750_p8 = pneg %p749_p6 }
  0x73   : > { %p755_p9 = pnand %p754_p3, %p750_p8 }
  0x75   : > { %758 = shalt.err (!%p755_p9)
}
  0x76   : > { %s759_s29 = scalar_lea.vmem %s240_s1, 128  ;;  %s851_s28 = smov [#allocation8]  }
  0x77   : > { %p760_p0 = scmp.ne.s32.totalorder %s240_s1, %s759_s29  ;;  %s764_s30 = sshll.u32 %s851_s28, 4  ;;  %s765_s30 = int_to_ptr.vmem [resolvable:$false] %s764_s30 }
  0x78   : > { %s766_s23 = scalar_lea.vmem %s765_s30, 256  ;;  %p767_p4 = scmp.lt.s32.totalorder %s240_s1, %s765_s30 }
  0x79   : > { %p762_p11 = pnand %p760_p0, %p960_p2  ;;  %p768_p5 = scmp.lt.s32.totalorder %s766_s23, %s759_s29 }
  0x7b   : > { %p763_p12 = pneg %p762_p11  ;;  %p769_p7 = por %p768_p5, %p767_p4 }
  0x7d   : > { %p770_p6 = pnand %p769_p7, %p763_p12 }
  0x7f   : > { %773 = shalt.err (!%p770_p6)
}
  0x80   : > { %611 = dma.hbm_to_vmem [thread:$0]  (!%p941_p13), %s1032_s6, 128, %s240_s1, %s229_s21  }
  0x81   : > { %p1147_p8 = scmp.ne.s32.totalorder %s1146_s17, 0 }
  0x82   : > { %s1055_s14 = sand.u32 (!%p1147_p8), 1, %s838_s16   ;;  %p1148_p2 = scmp.ne.s32.totalorder (!%p1147_p8), %s1138_s25, 0 }
  0x83   : > { %248 = sbr.rel (%p1147_p8) target bundleno = 549 (0x225), region = 36  ;;  %s577_s7 = sshll.u32 (!%p1147_p8), %s1055_s14, 3 }
  0x84   : > { %s251_s8 = scalar_lea.sflag (!%p1147_p8), [#allocation3], %s1055_s14  ;;  %s254_s0 = scalar_lea.vmem (!%p1147_p8), [#allocation2], %s577_s7 }
  0x88   : > { %817 = dma.done.wait (%p1148_p2), %s251_s8, 128  }
  0x89   : > { %819 = vsyncadd (%p1148_p2), %s251_s8, 4294967168  ;;  %s259_s5 = sand.u32 1, %s899_s19   ;;  %s263_s17 = scalar_lea.vmem [#allocation5], %s577_s7 }
  0x8a   : > { %s260_s9 = scalar_lea.sflag [#allocation6], %s259_s5 }
  0x8b   : > { %821 = dma.done.wait (%p1148_p2), %s260_s9, 256  }
  0x8c   : > { %823 = vsyncadd (%p1148_p2), %s260_s9, 4294967040  ;;  %s272_s6 = scalar_lea.vmem [#allocation7], %s577_s7  ;;  %s278_s13 = scalar_lea.sflag [#allocation9], %s1055_s14 }
  0x8d   : > { %s281_s1 = scalar_lea.vmem [#allocation8], %s577_s7 }
  0x8e   : > { %825 = dma.done.wait (%p1148_p2), %s278_s13, 128  }
  0x8f   : > { %827 = vsyncadd (%p1148_p2), %s278_s13, 4294967168  ;;  %v328_v0 = vld [vmem:[%s272_s6] sm:$0xff]  ;;  %vm331_vm0 = vcmask 261120   ;;  %v329_v2 = vld [vmem:[%s281_s1] sm:$0xff]  ;;  %v321_v44 = vlaneseq  ;;  %s581_s25 = sshll.u32 %s899_s19, 3  ;;  %vm385_vm10 = vcmask 7168  }
  0x90   : > { %v326_v1 = vld [vmem:[%s254_s0] sm:$0xff]  ;;  %v353_v3 = vmul.f32 %v328_v0, %v328_v0  ;;  %v364_v5 = vmul.f32 %v329_v2, %v329_v2  ;;  %v327_v6 = vld [vmem:[%s263_s17] sm:$0xff]  ;;  %v397_v12 = vmul.f32 %v329_v2, %v328_v0  ;;  %v323_v46 = vstv %s581_s25  ;;  %s582_s21 = sshll.u32 %s899_s19, 4  ;;  %s319_s22 = scalar_lea.vmem [#allocation10], %s1055_s14 }
  0x91   : > { %v330_v4 = vmul.f32 %v326_v1, %v326_v1  ;;  %v342_v7 = vmul.f32 %v327_v6, %v327_v6  ;;  %v375_v13 = vmul.f32 %v327_v6, %v326_v1  ;;  %v322_v45 = vshrl.u32 %v321_v44, 7  ;;  %s433_s24 = sshll.u32 %s319_s22, 4  ;;  %s1086_s28 = scalar_lea.hbm %s1127_s4, %s582_s21  ;;  %s434_s24 = int_to_ptr.vmem [resolvable:$true] %s433_s24 }
  0x92   : > { %v354_v8 = vsel %vm331_vm0, %v353_v3, 0.0  ;;  %v365_v10 = vsel %vm331_vm0, %v364_v5, 0.0  ;;  %v398_v14 = vsel %vm331_vm0, %v397_v12, 0.0  ;;  %s421_s30 = scalar_lea.sflag [#allocation4], %s1055_s14  ;;  %s774_s23 = scalar_lea.vmem %s434_s24, 16 }
  0x93   : > { %v332_v9 = vsel %vm331_vm0, %v330_v4, 0.0  ;;  %355 = vadd.xlane.f32.xlu1 %v354_v8  ;;  %v343_v11 = vsel %vm331_vm0, %v342_v7, 0.0  ;;  %v376_v15 = vsel %vm331_vm0, %v375_v13, 0.0  ;;  %v324_v48 = vadd.s32 %v323_v46, %v322_v45  ;;  %p775_p13 = scmp.ne.s32.totalorder %s434_s24, %s774_s23  ;;  %p1149_p10 = scmp.ne.s32.totalorder %s1139_s26, 0 }
  0x94   : > { %333 = vadd.xlane.f32.xlu0 %v332_v9  ;;  %s852_s19 = smov [#allocation10]  }
  0x95   : > { %vm325_vm9 = vcmp.lt.s32.totalorder %v324_v48, 16  ;;  %p776_p1 = pnand %p775_p13, %p1149_p10  ;;  %s778_s7 = sshll.u32 %s852_s19, 4  ;;  %s779_s7 = int_to_ptr.vmem [resolvable:$false] %s778_s7 }
  0x96   : > { %s780_s8 = scalar_lea.vmem %s779_s7, 32  ;;  %p781_p9 = scmp.lt.s32.totalorder %s434_s24, %s779_s7 }
  0x97   : > { %366 = vadd.xlane.f32.xlu1 %v365_v10  ;;  %p777_p3 = pneg %p776_p1  ;;  %p782_p0 = scmp.lt.s32.totalorder %s780_s8, %s774_s23 }
  0x98   : > { %344 = vadd.xlane.f32.xlu0 %v343_v11 }
  0x99   : > { %p783_p11 = por %p782_p0, %p781_p9 }
  0x9b   : > { %399 = vadd.xlane.f32.xlu1 %v398_v14  ;;  %p784_p12 = pnand %p783_p11, %p777_p3 }
  0x9c   : > { %377 = vadd.xlane.f32.xlu0 %v376_v15 }
 0x11c   : > { %v356_v16 = vpop.xlane.xlu1 %355 }
 0x11d   : > { %v334_v17 = vpop.xlane.xlu0 %333  ;;  %650 = vrsqrt.f32 %v356_v16  ;;  %vm359_vm1 = vcmp.eq.f32.partialorder %v356_v16, inf  ;;  %vm361_vm2 = vcmp.eq.f32.partialorder %v356_v16, 0.0  ;;  %v362_v25 = vand.u32 2147483648, %v356_v16 }
 0x11e   : > { %652 = vrsqrt.f32 %v334_v17  ;;  %vm337_vm3 = vcmp.eq.f32.partialorder %v334_v17, inf  ;;  %vm339_vm4 = vcmp.eq.f32.partialorder %v334_v17, 0.0  ;;  %v340_v28 = vand.u32 2147483648, %v334_v17 }
 0x120   : > { %v367_v18 = vpop.xlane.xlu1 %366 }
 0x121   : > { %v345_v19 = vpop.xlane.xlu0 %344  ;;  %654 = vrsqrt.f32 %v367_v18  ;;  %vm370_vm5 = vcmp.eq.f32.partialorder %v367_v18, inf  ;;  %v373_v31 = vand.u32 2147483648, %v367_v18  ;;  %vm372_vm6 = vcmp.eq.f32.partialorder %v367_v18, 0.0 }
 0x122   : > { %656 = vrsqrt.f32 %v345_v19  ;;  %vm348_vm7 = vcmp.eq.f32.partialorder %v345_v19, inf  ;;  %v351_v34 = vand.u32 2147483648, %v345_v19  ;;  %vm350_vm8 = vcmp.eq.f32.partialorder %v345_v19, 0.0 }
 0x124   : > { %v400_v47 = vpop.xlane.xlu1 %399 }
 0x125   : > { %v378_v49 = vpop.xlane.xlu0 %377 }
 0x12a   : > { %v651_v20 = vpop.eup %650 }
 0x12b   : > { %v653_v21 = vpop.eup %652  ;;  %v358_v22 = vmul.f32 %v651_v20, %v356_v16 }
 0x12c   : > { %v336_v23 = vmul.f32 %v653_v21, %v334_v17 }
 0x12d   : > { %v360_v27 = vsel %vm359_vm1, %v356_v16, %v358_v22 }
 0x12e   : > { %v655_v24 = vpop.eup %654  ;;  %v338_v30 = vsel %vm337_vm3, %v334_v17, %v336_v23  ;;  %v363_v35 = vsel %vm361_vm2, %v362_v25, %v360_v27 }
 0x12f   : > { %v657_v26 = vpop.eup %656  ;;  %v369_v29 = vmul.f32 %v655_v24, %v367_v18  ;;  %v341_v38 = vsel %vm339_vm4, %v340_v28, %v338_v30 }
 0x130   : > { %v347_v32 = vmul.f32 %v657_v26, %v345_v19 }
 0x131   : > { %v371_v33 = vsel %vm370_vm5, %v367_v18, %v369_v29 }
 0x132   : > { %v374_v36 = vsel %vm372_vm6, %v373_v31, %v371_v33  ;;  %v349_v37 = vsel %vm348_vm7, %v345_v19, %v347_v32 }
 0x133   : > { %v401_v39 = vmul.f32 %v374_v36, %v363_v35  ;;  %v352_v40 = vsel %vm350_vm8, %v351_v34, %v349_v37 }
 0x134   : > { %v379_v41 = vmul.f32 %v352_v40, %v341_v38 }
 0x135   : > { %v402_v42 = vmax.f32 %v401_v39, 1e-08 }
 0x136   : > { %v380_v43 = vmax.f32 %v379_v41, 1e-08 }
 0x137   : > { %658 = vrcp.f32 %v402_v42 }
 0x138   : > { %660 = vrcp.f32 %v380_v43 }
 0x144   : > { %v659_v50 = vpop.eup %658 }
 0x145   : > { %v661_v51 = vpop.eup %660  ;;  %v404_v52 = vmul.f32 %v659_v50, %v400_v47 }
 0x146   : > { %v382_v53 = vmul.f32 %v661_v51, %v378_v49 }
 0x147   : > { %v405_v54 = vmul.f32 %v404_v52, %v404_v52 }
 0x148   : > { %v383_v55 = vmul.f32 %v382_v53, %v382_v53 }
 0x149   : > { %v406_v56 = vsel %vm325_vm9, %v405_v54, 0.0 }
 0x14a   : > { %v407_v57 = vsel %vm385_vm10, %v406_v56, 0.0  ;;  %v384_v58 = vsel %vm325_vm9, %v383_v55, 0.0 }
 0x14b   : > { %408 = vadd.xlane.f32.xlu1 %v407_v57  ;;  %v386_v59 = vsel %vm385_vm10, %v384_v58, 0.0 }
 0x14c   : > { %387 = vadd.xlane.f32.xlu0 %v386_v59 }
 0x1d4   : > { %v409_v60 = vpop.xlane.xlu1 %408 }
 0x1d5   : > { %v410_v61 = vrot.slane %v409_v60, 4  ;;  %v388_v62 = vpop.xlane.xlu0 %387 }
 0x1d6   : > { %v389_v63 = vrot.slane %v388_v62, 4 }
 0x1d7   : > { %v411_v0 = vadd.f32 %v410_v61, %v409_v60 }
 0x1d8   : > { %v390_v1 = vadd.f32 %v389_v63, %v388_v62 }
 0x1d9   : > { %v412_v2 = vrot.slane %v411_v0, 2 }
 0x1da   : > { %v391_v3 = vrot.slane %v390_v1, 2 }
 0x1db   : > { %v413_v4 = vadd.f32 %v412_v2, %v411_v0 }
 0x1dc   : > { %v392_v5 = vadd.f32 %v391_v3, %v390_v1 }
 0x1dd   : > { %v414_v6 = vrot.slane %v413_v4, 1 }
 0x1de   : > { %v393_v7 = vrot.slane %v392_v5, 1 }
 0x1df   : > { %v415_v8 = vadd.f32 %v414_v6, %v413_v4 }
 0x1e0   : > { %v394_v9 = vadd.f32 %v393_v7, %v392_v5 }
 0x1e2   : > { %585 = vpush %v394_v9 }
 0x1e3   : > { %587 = vpush %v415_v8 }
 0x213   : > { %s586_s20 = spop %585 }
 0x214   : > { %s588_s12 = spop %587 }
 0x215   : > { %s417_s11 = sadd.f32 %s588_s12, %s586_s20 }
 0x217   : > { %v418_v10 = vstv %s417_s11 }
 0x218   : > { %419 = vst [vmem:[%s319_s22] sm:$0x1] %v418_v10 }
 0x219   : > { %787 = shalt.err (!%p784_p12)
}
 0x21a   : > { %s788_s0 = scalar_lea.hbm %s1086_s28, 16  ;;  %s792_s9 = scalar_lea.hbm %s1127_s4, 32 }
 0x21b   : > { %p789_p4 = scmp.ne.s32.totalorder %s1086_s28, %s788_s0  ;;  %p793_p6 = scmp.lt.s32.totalorder %s1086_s28, %s1127_s4 }
 0x21c   : > { %p794_p8 = scmp.lt.s32.totalorder %s792_s9, %s788_s0 }
 0x21d   : > { %p790_p5 = pnand %p789_p4, %p1149_p10 }
 0x21e   : > { %p795_p2 = por %p794_p8, %p793_p6 }
 0x21f   : > { %p791_p7 = pneg %p790_p5 }
 0x221   : > { %p796_p13 = pnand %p795_p2, %p791_p7 }
 0x223   : > { %799 = shalt.err (!%p796_p13)
}
 0x224   : > { %597 = dma.vmem_to_hbm [thread:$0]  (%p1149_p10), %s434_s24, 16, %s1086_s28, %s421_s30  }
 0x225 PF: > { %s445_s13 = sand.u32 1, %s834_s15   ;;  %p1150_p1 = scmp.ne.s32.totalorder %s1140_s27, 0 }
 0x226   : > { %p1151_p3 = scmp.ge.s32.totalorder %s846_s18, 2  ;;  %s446_s1 = scalar_lea.sflag [#allocation4], %s445_s13 }
 0x228   : > { %p613_p9 = pnand %p1151_p3, %p1150_p1 }
 0x22a   : > { %p614_p0 = pneg %p613_p9 }
 0x22c   : > { %829 = dma.done.wait (%p614_p0), %s446_s1, 16  }
 0x22d   : > { %831 = vsyncadd (%p614_p0), %s446_s1, 4294967280  ;;  %s1152_s18 = sld [smem:[#allocation16_spill]]  ;;  %s1155_s15 = smov %s838_s16 }
 0x22e   : > { %s1153_s25 = sld [smem:[#allocation15_spill]] }
 0x22f   : > { %s1154_s17 = sld [smem:[#allocation17_spill]] }
 0x233   : > { %p23_p11 = scmp.ge.s32.totalorder %s1152_s18, 4  }
 0x234   : > { %s1156_s16 = smov %s1153_s25 }
 0x235   :  { %25 = sbr.rel (!%p23_p11) target bundleno = 12 (0xc), region = 118 }
 0x23a   :  { %450 = vsyncpa [#allocation3], 1 }
 0x23b   :  { %452 = vsyncpa [#allocation3 + $0x1], 1 }
 0x23c   :  { %453 = vsyncpa [#allocation6], 1 }
 0x23d   :  { %455 = vsyncpa [#allocation6 + $0x1], 1 }
 0x23e   :  { %456 = vsyncpa [#allocation9], 1 }
 0x23f   :  { %458 = vsyncpa [#allocation9 + $0x1], 1 }
 0x240   :  { %459 = vsyncpa [#allocation4], 1 }
 0x241   :  { %461 = vsyncpa [#allocation4 + $0x1], 1 }

</bundles_post_ra>
